<compile_context>
chip_gen: v7x
topology: tpu7x:2x2x1
jax: 0.10.0
libtpu: 0.0.40
codegen_flags: <defaults>
</compile_context>

<pallas_src>
import functools

import jax
import jax.numpy as jnp
from jax.experimental import pallas as pl
from jax.experimental.pallas import tpu as pltpu

_MIB = 1024 * 1024


def _round_up(x, m):
    return (x + m - 1) // m * m


# ---------------------------------------------------------------------------
# Kernels
# ---------------------------------------------------------------------------
def mlp_resident_kernel(x_ref, w1_ref, b1_ref, w2_ref, b2_ref, o_ref, *,
                        downcast_hidden=True):
    # x_ref:  (TB, IN_pad)     input dtype (f32); cast to MXU dtype in-kernel
    # w1_ref: (IN_pad, H_pad)  compute dtype (bf16), MXU-natural (K, N) layout
    # b1_ref: (1, H_pad)       f32
    # w2_ref: (H_pad, O_pad)   compute dtype
    # b2_ref: (1, O_pad)       f32
    # o_ref:  (TB, O_pad)      output dtype
    x = x_ref[...].astype(w1_ref.dtype)
    h = jnp.dot(x, w1_ref[...], preferred_element_type=jnp.float32)
    h = jnp.maximum(h + b1_ref[...], 0.0)                 # f32 bias + ReLU
    h2 = h.astype(w2_ref.dtype) if downcast_hidden else h
    out = jnp.dot(h2, w2_ref[...], preferred_element_type=jnp.float32)
    o_ref[...] = (out + b2_ref[...]).astype(o_ref.dtype)


def mlp_streaming_kernel(x_ref, w1_ref, b1_ref, w2_ref, b2_ref, o_ref, acc_ref,
                         *, downcast_hidden=True):
    # Hidden dim streamed in chunks along grid axis 1 ("arbitrary"); partial
    # second-layer products accumulate in an f32 VMEM scratch.
    k = pl.program_id(1)

    @pl.when(k == 0)
    def _():
        acc_ref[...] = jnp.zeros_like(acc_ref)

    x = x_ref[...].astype(w1_ref.dtype)
    h = jnp.dot(x, w1_ref[...], preferred_element_type=jnp.float32)
    h = jnp.maximum(h + b1_ref[...], 0.0)
    h2 = h.astype(w2_ref.dtype) if downcast_hidden else h
    acc_ref[...] += jnp.dot(h2, w2_ref[...], preferred_element_type=jnp.float32)

    @pl.when(k == pl.num_programs(1) - 1)
    def _():
        o_ref[...] = (acc_ref[...] + b2_ref[...]).astype(o_ref.dtype)


# ---------------------------------------------------------------------------
# One-time capability / hardware queries
# ---------------------------------------------------------------------------
_SINGLE_BUFFER_OK = None  # lazily resolved: does pipeline_mode=pl.Buffered(1) lower?


def _probe_copy_kernel(x_ref, o_ref):
    o_ref[...] = x_ref[...]


def _single_buffer_supported():
    """True iff pipeline_mode=pl.Buffered(1) lowers and runs on this build."""
    global _SINGLE_BUFFER_OK
    if _SINGLE_BUFFER_OK is None:
        try:
            f = pl.pallas_call(
                _probe_copy_kernel,
                out_shape=jax.ShapeDtypeStruct((16, 128), jnp.float32),
                grid=(2,),
                in_specs=[pl.BlockSpec((8, 128), lambda i: (0, 0),
                                       pipeline_mode=pl.Buffered(1))],
                out_specs=pl.BlockSpec((8, 128), lambda i: (i, 0)))
            jax.block_until_ready(f(jnp.zeros((8, 128), jnp.float32)))
            _SINGLE_BUFFER_OK = True
        except Exception:  # older Pallas: fall back to default double-buffering
            _SINGLE_BUFFER_OK = False
    return _SINGLE_BUFFER_OK


def _vmem_budget_bytes():
    try:
        cap = pltpu.get_tpu_info().vmem_capacity_bytes
    except Exception:
        cap = 64 * _MIB              # conservative floor (v7x physical VMEM)
    return int(cap * 0.85)           # leave ~15% headroom for compiler scratch


# ---------------------------------------------------------------------------
# Parameter packing + forward
# ---------------------------------------------------------------------------
def prepare_params(w1, b1, w2, b2, *, compute_dtype=jnp.bfloat16):
    """One-time host-side packing of PyTorch nn.Linear parameters.

    W1 (hidden, in) / W2 (out, hidden) are transposed to MXU-natural (K, N)
    layout, zero-padded so every matmul dim is a multiple of 128 (lane-dense),
    and cast to the MXU compute dtype.  Biases stay float32.
    Zero padding is numerically benign: padded x cols x padded-zero W1 rows
    contribute 0; padded hidden units have b1 = 0 -> relu(0) = 0 -> padded W2
    rows (also 0) contribute 0.
    """
    hidden, in_size = w1.shape
    out_size, _ = w2.shape
    in_pad = _round_up(in_size, 128)
    h_pad = _round_up(hidden, 128)
    o_pad = _round_up(out_size, 128)

    w1_p = jnp.pad(w1.T, ((0, in_pad - in_size), (0, h_pad - hidden))).astype(compute_dtype)
    b1_p = jnp.pad(b1, (0, h_pad - hidden)).astype(jnp.float32).reshape(1, h_pad)
    w2_p = jnp.pad(w2.T, ((0, h_pad - hidden), (0, o_pad - out_size))).astype(compute_dtype)
    b2_p = jnp.pad(b2, (0, o_pad - out_size)).astype(jnp.float32).reshape(1, o_pad)
    return w1_p, b1_p, w2_p, b2_p


def dnn_forward(x, w1_p, b1_p, w2_p, b2_p, *, out_size=None, out_dtype=None,
                tile_b=None, tile_h=None, stream_hidden=None,
                downcast_hidden=True):
    """Fused forward of DNNModel.  x: (B, in_size) in its natural dtype;
    w*_p / b*_p come from prepare_params (padded, transposed, bf16/f32)."""
    B, in_size = x.shape
    in_pad, h_pad = w1_p.shape
    h_pad2, o_pad = w2_p.shape
    assert h_pad == h_pad2, "w1_p / w2_p hidden dims disagree"
    assert in_size <= in_pad
    if out_size is None:
        out_size = o_pad
    if out_dtype is None:
        out_dtype = x.dtype          # pass jnp.bfloat16 to halve output writeback

    x_item = jnp.dtype(x.dtype).itemsize
    o_item = jnp.dtype(out_dtype).itemsize
    c_item = jnp.dtype(w1_p.dtype).itemsize

    vmem_budget = _vmem_budget_bytes()
    sb_ok = _single_buffer_supported()
    wbuf = 1 if sb_ok else 2                               # buffering of resident blocks
    weights_bytes = (in_pad * h_pad + h_pad * o_pad) * c_item

    # Path selection: stream the hidden dim when the weights would eat more
    # than ~half of this generation's VMEM budget if kept resident.
    if stream_hidden is None:
        stream_hidden = wbuf * weights_bytes > vmem_budget // 2

    # Hidden chunk size (streaming path): multiple of 128 that divides h_pad.
    if stream_hidden:
        if tile_h is None:
            tile_h = 128
            for cand in (1024, 512, 256):
                if (h_pad % cand == 0
                        and 2 * (in_pad + o_pad) * cand * c_item <= vmem_budget // 2):
                    tile_h = cand
                    break
        else:
            tile_h = max(128, (tile_h // 128) * 128)
            if h_pad % tile_h != 0:
                tile_h = 128
    else:
        tile_h = h_pad

    # Batch tile: 16-aligned (bf16 sublane packing), 256/512 rows for large B,
    # and split so the "parallel" batch axis has >= 2 steps (two v7x TCs).
    if tile_b is None:
        if B <= 16:
            tile_b = _round_up(max(B, 8), 8)
        elif B >= 1024:
            tile_b = 512
        elif B >= 512:
            tile_b = 256
        else:
            tile_b = min(256, _round_up(-(-B // 2), 16))
    else:
        tile_b = max(8, _round_up(tile_b, 8))

    # Shrink tile_b if the per-step VMEM footprint would exceed the budget.
    def _vmem_estimate(tb):
        est = (2 * tb * in_pad * x_item          # x tile (double-buffered)
               + 2 * tb * o_pad * o_item         # out tile (double-buffered)
               + tb * tile_h * 4)                # f32 hidden intermediate
        if stream_hidden:
            est += (2 * (in_pad * tile_h + tile_h * o_pad) * c_item   # weight chunks
                    + 2 * tile_h * 4 + wbuf * o_pad * 4               # bias blocks
                    + tb * o_pad * 4)                                 # f32 accumulator
        else:
            est += wbuf * (weights_bytes + (h_pad + o_pad) * 4)       # resident W / b
        return est

    while _vmem_estimate(tile_b) > vmem_budget and tile_b > 8:
        tile_b = max(8, (tile_b // 2) // 8 * 8)

    b_pad = _round_up(B, tile_b)

    # Pad x only when needed (dtype cast happens inside the kernel, not on host).
    if b_pad != B or in_pad != in_size:
        x_p = jnp.pad(x, ((0, b_pad - B), (0, in_pad - in_size)))
    else:
        x_p = x

    vmem_limit = int(min(max(2 * _vmem_estimate(tile_b), 32 * _MIB), vmem_budget))

    flops = 2 * b_pad * (in_pad * h_pad + h_pad * o_pad)
    bytes_accessed = (b_pad * in_pad * x_item
                      + weights_bytes + (h_pad + o_pad) * 4
                      + b_pad * o_pad * o_item)
    cost = pl.CostEstimate(flops=int(flops), transcendentals=0,
                           bytes_accessed=int(bytes_accessed))

    weight_kw = {"pipeline_mode": pl.Buffered(1)} if sb_ok else {}

    if stream_hidden:
        grid = (b_pad // tile_b, h_pad // tile_h)
        in_specs = [
            pl.BlockSpec((tile_b, in_pad), lambda i, k: (i, 0)),          # x tile
            pl.BlockSpec((in_pad, tile_h), lambda i, k: (0, k)),          # W1 chunk
            pl.BlockSpec((1, tile_h), lambda i, k: (0, k)),               # b1 chunk
            pl.BlockSpec((tile_h, o_pad), lambda i, k: (k, 0)),           # W2 chunk
            pl.BlockSpec((1, o_pad), lambda i, k: (0, 0), **weight_kw),   # b2
        ]
        out_specs = pl.BlockSpec((tile_b, o_pad), lambda i, k: (i, 0))
        scratch = [pltpu.VMEM((tile_b, o_pad), jnp.float32)]
        kernel = functools.partial(mlp_streaming_kernel,
                                   downcast_hidden=downcast_hidden)
        semantics = ("parallel", "arbitrary")
    else:
        grid = (b_pad // tile_b,)
        in_specs = [
            pl.BlockSpec((tile_b, in_pad), lambda i: (i, 0)),             # x tile
            pl.BlockSpec((in_pad, h_pad), lambda i: (0, 0), **weight_kw),  # W1 resident
            pl.BlockSpec((1, h_pad), lambda i: (0, 0), **weight_kw),       # b1
            pl.BlockSpec((h_pad, o_pad), lambda i: (0, 0), **weight_kw),   # W2 resident
            pl.BlockSpec((1, o_pad), lambda i: (0, 0), **weight_kw),       # b2
        ]
        out_specs = pl.BlockSpec((tile_b, o_pad), lambda i: (i, 0))
        scratch = []
        kernel = functools.partial(mlp_resident_kernel,
                                   downcast_hidden=downcast_hidden)
        semantics = ("parallel",)

    out_padded = pl.pallas_call(
        kernel,
        out_shape=jax.ShapeDtypeStruct((b_pad, o_pad), out_dtype),
        grid_spec=pltpu.PrefetchScalarGridSpec(
            num_scalar_prefetch=0,
            grid=grid,
            in_specs=in_specs,
            out_specs=out_specs,
            scratch_shapes=scratch),
        compiler_params=pltpu.CompilerParams(
            dimension_semantics=semantics,
            vmem_limit_bytes=vmem_limit),
        cost_estimate=cost,
    )(x_p, w1_p, b1_p, w2_p, b2_p)

    return out_padded[:B, :out_size]


if __name__ == "__main__":
    def reference(x, w1, b1, w2, b2):   # pure-JAX f32 PyTorch forward
        return jnp.maximum(x @ w1.T + b1, 0.0) @ w2.T + b2

    key = jax.random.PRNGKey(0)

    # --- Test 1: small shapes, fully-resident weight path -------------------
    B, in_size, hidden, out_size = 8, 32, 64, 16
    kx, kw1, kb1, kw2, kb2, key = jax.random.split(key, 6)
    x = jax.random.normal(kx, (B, in_size), dtype=jnp.float32)
    w1 = jax.random.normal(kw1, (hidden, in_size), dtype=jnp.float32) * 0.1
    b1 = jax.random.normal(kb1, (hidden,), dtype=jnp.float32) * 0.1
    w2 = jax.random.normal(kw2, (out_size, hidden), dtype=jnp.float32) * 0.1
    b2 = jax.random.normal(kb2, (out_size,), dtype=jnp.float32) * 0.1

    params = prepare_params(w1, b1, w2, b2)
    out = jax.block_until_ready(dnn_forward(x, *params, out_size=out_size))
    ref = reference(x, w1, b1, w2, b2)
    assert out.shape == (B, out_size), out.shape
    err = float(jnp.max(jnp.abs(out - ref)))
    assert jnp.allclose(out, ref, atol=4e-2, rtol=4e-2), \
        f"resident path mismatch vs reference (max abs err {err})"

    # --- Test 2: exercise the hidden-dim streaming path (2 chunks of 128) ---
    B2, in2, hidden2, out2 = 32, 32, 256, 16
    kx, kw1, kb1, kw2, kb2, key = jax.random.split(key, 6)
    x2 = jax.random.normal(kx, (B2, in2), dtype=jnp.float32)
    w1s = jax.random.normal(kw1, (hidden2, in2), dtype=jnp.float32) * 0.1
    b1s = jax.random.normal(kb1, (hidden2,), dtype=jnp.float32) * 0.1
    w2s = jax.random.normal(kw2, (out2, hidden2), dtype=jnp.float32) * 0.1
    b2s = jax.random.normal(kb2, (out2,), dtype=jnp.float32) * 0.1

    params2 = prepare_params(w1s, b1s, w2s, b2s)
    out_s = jax.block_until_ready(
        dnn_forward(x2, *params2, out_size=out2, stream_hidden=True, tile_h=128))
    ref2 = reference(x2, w1s, b1s, w2s, b2s)
    assert out_s.shape == (B2, out2), out_s.shape
    err2 = float(jnp.max(jnp.abs(out_s - ref2)))
    assert jnp.allclose(out_s, ref2, atol=4e-2, rtol=4e-2), \
        f"streaming path mismatch vs reference (max abs err {err2})"

    print("KERNEL_OK")
</pallas_src>

<mosaic_0001>
module attributes {stable_mosaic.version = 11 : i64} {
  func.func @_probe_copy_kernel(%arg0: i32, %arg1: memref<8x128xf32, #tpu.memory_space<vmem>>, %arg2: memref<8x128xf32, #tpu.memory_space<vmem>>) attributes {dimension_semantics = [#tpu.dimension_semantics<arbitrary>], iteration_bounds = array<i64: 2>, scalar_prefetch = 0 : i64, scratch_operands = 0 : i64, tpu.core_type = #tpu.core_type<tc>, window_params = [{pipeline_mode = #tpu.pipeline_mode<synchronous>, transform_indices = @transform_0, window_bounds = array<i64: 8, 128>}, {transform_indices = @transform_1, window_bounds = array<i64: 8, 128>}]} {
    %c0 = arith.constant 0 : index
    %c0_0 = arith.constant 0 : index
    %0 = vector.load %arg1[%c0, %c0_0] : memref<8x128xf32, #tpu.memory_space<vmem>>, vector<8x128xf32>
    %c0_1 = arith.constant 0 : index
    %c0_2 = arith.constant 0 : index
    %1 = vector.load %arg2[%c0_1, %c0_2] : memref<8x128xf32, #tpu.memory_space<vmem>>, vector<8x128xf32>
    tpu.vector_store %arg2[%c0_1, %c0_2], %0 {strides = array<i32>} : memref<8x128xf32, #tpu.memory_space<vmem>>, vector<8x128xf32>,
    return
  }
  func.func @transform_0(%arg0: i32) -> (i32, i32) {
    %c0_i32 = arith.constant 0 : i32
    %c0_i32_0 = arith.constant 0 : i32
    %c0_i32_1 = arith.constant 0 : i32
    return %c0_i32, %c0_i32_0 : i32, i32
  }
  func.func @transform_1(%arg0: i32) -> (i32, i32) {
    %c0_i32 = arith.constant 0 : i32
    %c0_i32_0 = arith.constant 0 : i32
    return %arg0, %c0_i32 : i32, i32
  }
}

module attributes {stable_mosaic.version = 11 : i64} {
  func.func @mlp_resident_kernel(%arg0: i32, %arg1: memref<8x128xf32, #tpu.memory_space<vmem>>, %arg2: memref<128x128xbf16, #tpu.memory_space<vmem>>, %arg3: memref<1x128xf32, #tpu.memory_space<vmem>>, %arg4: memref<128x128xbf16, #tpu.memory_space<vmem>>, %arg5: memref<1x128xf32, #tpu.memory_space<vmem>>, %arg6: memref<8x128xf32, #tpu.memory_space<vmem>>) attributes {dimension_semantics = [#tpu.dimension_semantics<parallel>], iteration_bounds = array<i64: 1>, scalar_prefetch = 0 : i64, scratch_operands = 0 : i64, tpu.core_type = #tpu.core_type<tc>, window_params = [{transform_indices = @transform_0, window_bounds = array<i64: 8, 128>}, {pipeline_mode = #tpu.pipeline_mode<synchronous>, transform_indices = @transform_1, window_bounds = array<i64: 128, 128>}, {pipeline_mode = #tpu.pipeline_mode<synchronous>, transform_indices = @transform_2, window_bounds = array<i64: 1, 128>}, {pipeline_mode = #tpu.pipeline_mode<synchronous>, transform_indices = @transform_3, window_bounds = array<i64: 128, 128>}, {pipeline_mode = #tpu.pipeline_mode<synchronous>, transform_indices = @transform_4, window_bounds = array<i64: 1, 128>}, {transform_indices = @transform_5, window_bounds = array<i64: 8, 128>}]} {
    %c0 = arith.constant 0 : index
    %c0_0 = arith.constant 0 : index
    %0 = vector.load %arg1[%c0, %c0_0] : memref<8x128xf32, #tpu.memory_space<vmem>>, vector<8x128xf32>
    %1 = arith.truncf %0 : vector<8x128xf32> to vector<8x128xbf16>
    %c0_1 = arith.constant 0 : index
    %c0_2 = arith.constant 0 : index
    %2 = vector.load %arg2[%c0_1, %c0_2] : memref<128x128xbf16, #tpu.memory_space<vmem>>, vector<128x128xbf16>
    %cst = arith.constant dense<0.000000e+00> : vector<8x128xf32>
    %3 = tpu.matmul %1, %2, %cst {dimension_numbers = #tpu.dot_dimension_numbers<[1], [0], [0], [1], [0, 0, 1, 1], [], []>} : vector<8x128xbf16>, vector<128x128xbf16>, vector<8x128xf32> -> vector<8x128xf32>
    %c0_3 = arith.constant 0 : index
    %c0_4 = arith.constant 0 : index
    %4 = vector.load %arg3[%c0_3, %c0_4] : memref<1x128xf32, #tpu.memory_space<vmem>>, vector<1x128xf32>
    %5 = vector.broadcast %4 : vector<1x128xf32> to vector<8x128xf32>
    %6 = arith.addf %3, %5 : vector<8x128xf32>
    %cst_5 = arith.constant 0.000000e+00 : f32
    %7 = vector.broadcast %cst_5 : f32 to vector<8x128xf32>
    %8 = arith.maximumf %6, %7 : vector<8x128xf32>
    %9 = arith.truncf %8 : vector<8x128xf32> to vector<8x128xbf16>
    %c0_6 = arith.constant 0 : index
    %c0_7 = arith.constant 0 : index
    %10 = vector.load %arg4[%c0_6, %c0_7] : memref<128x128xbf16, #tpu.memory_space<vmem>>, vector<128x128xbf16>
    %cst_8 = arith.constant dense<0.000000e+00> : vector<8x128xf32>
    %11 = tpu.matmul %9, %10, %cst_8 {dimension_numbers = #tpu.dot_dimension_numbers<[1], [0], [0], [1], [0, 0, 1, 1], [], []>} : vector<8x128xbf16>, vector<128x128xbf16>, vector<8x128xf32> -> vector<8x128xf32>
    %c0_9 = arith.constant 0 : index
    %c0_10 = arith.constant 0 : index
    %12 = vector.load %arg5[%c0_9, %c0_10] : memref<1x128xf32, #tpu.memory_space<vmem>>, vector<1x128xf32>
    %13 = vector.broadcast %12 : vector<1x128xf32> to vector<8x128xf32>
    %14 = arith.addf %11, %13 : vector<8x128xf32>
    %c0_11 = arith.constant 0 : index
    %c0_12 = arith.constant 0 : index
    %15 = vector.load %arg6[%c0_11, %c0_12] : memref<8x128xf32, #tpu.memory_space<vmem>>, vector<8x128xf32>
    tpu.vector_store %arg6[%c0_11, %c0_12], %14 {strides = array<i32>} : memref<8x128xf32, #tpu.memory_space<vmem>>, vector<8x128xf32>,
    return
  }
  func.func @transform_0(%arg0: i32) -> (i32, i32) {
    %c0_i32 = arith.constant 0 : i32
    %c0_i32_0 = arith.constant 0 : i32
    return %arg0, %c0_i32 : i32, i32
  }
  func.func @transform_1(%arg0: i32) -> (i32, i32) {
    %c0_i32 = arith.constant 0 : i32
    %c0_i32_0 = arith.constant 0 : i32
    %c0_i32_1 = arith.constant 0 : i32
    return %c0_i32, %c0_i32_0 : i32, i32
  }
  func.func @transform_2(%arg0: i32) -> (i32, i32) {
    %c0_i32 = arith.constant 0 : i32
    %c0_i32_0 = arith.constant 0 : i32
    %c0_i32_1 = arith.constant 0 : i32
    return %c0_i32, %c0_i32_0 : i32, i32
  }
  func.func @transform_3(%arg0: i32) -> (i32, i32) {
    %c0_i32 = arith.constant 0 : i32
    %c0_i32_0 = arith.constant 0 : i32
    %c0_i32_1 = arith.constant 0 : i32
    return %c0_i32, %c0_i32_0 : i32, i32
  }
  func.func @transform_4(%arg0: i32) -> (i32, i32) {
    %c0_i32 = arith.constant 0 : i32
    %c0_i32_0 = arith.constant 0 : i32
    %c0_i32_1 = arith.constant 0 : i32
    return %c0_i32, %c0_i32_0 : i32, i32
  }
  func.func @transform_5(%arg0: i32) -> (i32, i32) {
    %c0_i32 = arith.constant 0 : i32
    %c0_i32_0 = arith.constant 0 : i32
    return %arg0, %c0_i32 : i32, i32
  }
}

</mosaic_0001>

<bundles_post_ra>
// kernel: tpu_custom_call.1
= control target key start
LH: loop header
LB: loop body
LE: loop exit
PB: predicated region body
PF: predicated region fallthrough
CT: control target
= control target key end

     0   :  { %6 = vsyncpa [#allocation3], 0  ;;  %s481_s0 = inlined_call_operand.hbm [shape: f32[8,128], index: 0, kind: input, shape index: {}]   ;;  %s482_s1 = inlined_call_operand.hbm [shape: f32[16,128], index: 1, kind: output, shape index: {}]  }
   0x1   :  { %7 = vsyncpa [#allocation4], 0 }
   0x2   :  { %9 = vsyncpa [#allocation4 + $0x1], 0  ;;  %s351_s6 = smov 0   ;;  %s353_s7 = smov 0  }
   0x3   :  { %s355_s8 = smov 0   ;;  %s357_s9 = smov 0  }
   0x4 LB: > { %s372_s10 = sadd.s32 4294967295, %s337_s9   ;;  %s183_s11 = sadd.s32 4294967294, %s337_s9   ;;  %s337_s9 = sphi %s357_s9, %s498_s9   ;;  %s333_s8 = sphi %s355_s8, %s497_s8   ;;  %s329_s7 = sphi %s353_s7, %s496_s7   ;;  %s325_s6 = sphi %s351_s6, %s495_s6  }
   0x5   : > { %s376_s12 = sadd.s32 1, %s337_s9   ;;  %s43_s13 = sadd.s32 1, %s333_s8 }
   0x6   : > { %s40_s14 = ssub.s32 %s337_s9, %s376_s12  ;;  %p53_p0 = scmp.ne.s32.totalorder %s333_s8, %s329_s7 }
   0x7   : > { %p41_p1 = scmp.eq.s32.totalorder %s40_s14, 0  ;;  %p54_p2 = scmp.eq.s32.totalorder %s372_s10, 1 }
   0x8   : > { %p59_p3 = scmp.ne.s32.totalorder %s329_s7, %s325_s6  ;;  %p60_p4 = scmp.eq.s32.totalorder %s183_s11, 1 }
   0x9   : > { %s387_s15 = scalar_select %p41_p1, %s333_s8, %s43_s13  }
   0xa   : > { %p389_p5 = por %p54_p2, %p53_p0  ;;  %p393_p6 = por %p60_p4, %p59_p3 }
   0xb   : > { %p184_p7 = scmp.ge.s32.totalorder %s337_s9, 1  ;;  %p67_p8 = scmp.lt.s32.totalorder %s337_s9, 3 }
   0xc   : > { %s486_s16 = scalar_select %p389_p5, 1, 0 }
   0xd   : > { %s487_s17 = scalar_select %p393_p6, 1, 0 }
   0xe   : > { %p483_p9 = scmp.eq.s32.totalorder %s372_s10, 0  ;;  %p400_p10 = pnand %p184_p7, %p67_p8 }
   0xf   : > { %s339_s19 = smov [#allocation2]   ;;  %s243_s24 = scalar_lea.hbm %s481_s0, 128 }
  0x10   : > { %s488_s18 = scalar_select %p400_p10, 1, 0 }
  0x11   : > { %s80_s20 = sshll.u32 %s339_s19, 4  ;;  %p199_p11 = pneg %p400_p10  ;;  %s81_s20 = int_to_ptr.vmem [resolvable:$true] %s80_s20 }
  0x12   : > { %p244_p13 = scmp.ne.s32.totalorder %s481_s0, %s243_s24  ;;  %p250_p3 = scmp.lt.u32.totalorder %s243_s24, %s481_s0 }
  0x13   : > { %p408_p12 = pnand %p483_p9, %p199_p11 }
  0x15   : > { %p245_p0 = pneg %p408_p12 }
  0x17   : > { %p246_p1 = pnand %p245_p0, %p244_p13 }
  0x19   : > { %p247_p2 = pneg %p246_p1 }
  0x1b   : > { %p252_p4 = pnand %p250_p3, %p247_p2 }
  0x1d   : > { %255 = shalt.err (!%p252_p4)
}
  0x1e   : > { %s256_s29 = scalar_lea.vmem %s81_s20, 128  ;;  %p264_p9 = scmp.lt.s32.totalorder %s81_s20, %s81_s20 }
  0x1f   : > { %p257_p7 = scmp.ne.s32.totalorder %s81_s20, %s256_s29  ;;  %p265_p6 = scmp.lt.s32.totalorder %s256_s29, %s256_s29 }
  0x21   : > { %p259_p8 = pnand %p257_p7, %p245_p0  ;;  %p266_p5 = por %p265_p6, %p264_p9 }
  0x23   : > { %p260_p11 = pneg %p259_p8 }
  0x25   : > { %p267_p10 = pnand %p266_p5, %p260_p11 }
  0x27   : > { %270 = shalt.err (!%p267_p10)
}
  0x28   : > { %202 = dma.hbm_to_vmem [thread:$0]  (!%p408_p12), %s481_s0, 128, %s81_s20, [#allocation3]  }
  0x29   : > { %p490_p13 = scmp.ne.s32.totalorder %s488_s18, 0 }
  0x2a   : > { %p491_p1 = scmp.eq.s32.totalorder (!%p490_p13), %s372_s10, 0 }
  0x2b   : > { %93 = sbr.rel (%p490_p13) target bundleno = 77 (0x4d), region = 24 }
  0x32   : > { %316 = dma.done.wait (%p491_p1), [#allocation3], 128   ;;  %p492_p0 = pmov %p491_p1 }
  0x33   : > { %s105_s3 = sand.u32 1, %s329_s7   ;;  %s190_s13 = sshll.u32 %s372_s10, 7  ;;  %v108_v0 = vld [vmem:[#allocation2] sm:$0xff] }
  0x34   : > { %318 = vsyncadd (%p492_p0), [#allocation3], 4294967168  ;;  %s188_s4 = sshll.u32 %s105_s3, 3  ;;  %s441_s18 = scalar_lea.hbm %s482_s1, %s190_s13 }
  0x35   : > { %s107_s5 = scalar_lea.vmem [#allocation5], %s188_s4  ;;  %s111_s20 = scalar_lea.sflag [#allocation4], %s105_s3 }
  0x36   : > { %s124_s11 = sshll.u32 %s107_s5, 4  ;;  %109 = vst [vmem:[%s107_s5] sm:$0xff] %v108_v0  ;;  %p493_p6 = scmp.ne.s32.totalorder %s486_s16, 0  ;;  %s436_s11 = int_to_ptr.vmem [resolvable:$true] %s124_s11 }
  0x37   : > { %s271_s21 = scalar_lea.vmem %s436_s11, 128  ;;  %s340_s22 = smov [#allocation5]  }
  0x38   : > { %p272_p5 = scmp.ne.s32.totalorder %s436_s11, %s271_s21  ;;  %s275_s10 = sshll.u32 %s340_s22, 4  ;;  %s276_s10 = int_to_ptr.vmem [resolvable:$false] %s275_s10 }
  0x39   : > { %s277_s23 = scalar_lea.vmem %s276_s10, 256  ;;  %p278_p12 = scmp.lt.s32.totalorder %s436_s11, %s276_s10 }
  0x3a   : > { %p273_p9 = pnand %p272_p5, %p493_p6  ;;  %p279_p2 = scmp.lt.s32.totalorder %s277_s23, %s271_s21 }
  0x3c   : > { %p274_p10 = pneg %p273_p9  ;;  %p280_p3 = por %p279_p2, %p278_p12 }
  0x3e   : > { %p281_p4 = pnand %p280_p3, %p274_p10 }
  0x40   : > { %284 = shalt.err (!%p281_p4)
}
  0x41   : > { %s285_s24 = scalar_lea.hbm %s441_s18, 128  ;;  %s289_s27 = scalar_lea.hbm %s482_s1, 256 }
  0x42   : > { %p286_p7 = scmp.ne.s32.totalorder %s441_s18, %s285_s24  ;;  %p290_p13 = scmp.lt.u32.totalorder %s441_s18, %s482_s1 }
  0x43   : > { %p291_p1 = scmp.lt.u32.totalorder %s289_s27, %s285_s24  ;;  %p293_p5 = scmp.lt.u32.totalorder %s285_s24, %s441_s18 }
  0x44   : > { %p287_p8 = pnand %p286_p7, %p493_p6 }
  0x45   : > { %p292_p0 = por %p291_p1, %p290_p13 }
  0x46   : > { %p288_p11 = pneg %p287_p8 }
  0x47   : > { %p294_p9 = por %p293_p5, %p292_p0 }
  0x49   : > { %p295_p10 = pnand %p294_p9, %p288_p11 }
  0x4b   : > { %298 = shalt.err (!%p295_p10)
}
  0x4c   : > { %197 = dma.vmem_to_hbm [thread:$0]  (%p493_p6), %s436_s11, 128, %s441_s18, %s111_s20  }
  0x4d PF: > { %p209_p12 = scmp.ge.s32.totalorder %s337_s9, 2  ;;  %s136_s30 = sand.u32 1, %s325_s6  }
  0x4e   : > { %p494_p2 = scmp.ne.s32.totalorder %s487_s17, 0  ;;  %s137_s2 = scalar_lea.sflag [#allocation4], %s136_s30 }
  0x50   : > { %p204_p3 = pnand %p209_p12, %p494_p2 }
  0x52   : > { %320 = dma.done.wait (!%p204_p3), %s137_s2, 128  }
  0x53   : > { %322 = vsyncadd (!%p204_p3), %s137_s2, 4294967168  ;;  %p12_p4 = scmp.ge.s32.totalorder %s376_s12, 4   ;;  %s495_s6 = smov %s329_s7 }
  0x54   : > { %s496_s7 = smov %s333_s8  ;;  %s497_s8 = smov %s387_s15 }
  0x55   : > { %s498_s9 = smov %s376_s12  ;;  %14 = sbr.rel (!%p12_p4) target bundleno = 4 (0x4), region = 61 }
  0x5c   :  { %142 = vsyncpa [#allocation3], 1 }
  0x5d   :  { %144 = vsyncpa [#allocation3 + $0x1], 1 }
  0x5e   :  { %145 = vsyncpa [#allocation4], 1 }
  0x5f   :  { %147 = vsyncpa [#allocation4 + $0x1], 1 }

// kernel: tpu_custom_call.1
= control target key start
LH: loop header
LB: loop body
LE: loop exit
PB: predicated region body
PF: predicated region fallthrough
CT: control target
= control target key end

     0   :  { %10 = vsyncpa [#allocation3], 0  ;;  %s596_s0 = inlined_call_operand.hbm [shape: f32[8,128], index: 0, kind: input, shape index: {}]   ;;  %s597_s1 = inlined_call_operand.hbm [shape: bf16[128,128], index: 1, kind: input, shape index: {}]   ;;  %s598_s2 = inlined_call_operand.vmem [shape: f32[1,128], index: 2, kind: input, shape index: {}]   ;;  %s599_s3 = inlined_call_operand.hbm [shape: bf16[128,128], index: 3, kind: input, shape index: {}]   ;;  %s600_s4 = inlined_call_operand.vmem [shape: f32[1,128], index: 4, kind: input, shape index: {}]   ;;  %s601_s5 = inlined_call_operand.hbm [shape: f32[8,128], index: 5, kind: output, shape index: {}]  }
   0x1   :  { %11 = vsyncpa [#allocation6], 0 }
   0x2   :  { %12 = vsyncpa [#allocation4], 0  ;;  %s498_s18 = smov [#allocation5]   ;;  %s404_s22 = scalar_lea.hbm %s597_s1, 1024 }
   0x3   :  { %s28_s19 = sshll.u32 %s498_s18, 4  ;;  %p405_p0 = scmp.ne.s32.totalorder %s597_s1, %s404_s22  ;;  %s29_s19 = int_to_ptr.vmem [resolvable:$true] %s28_s19 }
   0x4   :  { %p408_p1 = scmp.lt.u32.totalorder %s404_s22, %s597_s1 }
   0x6   :  { %p410_p2 = pnand %p408_p1, %p405_p0 }
   0x8   :  { %413 = shalt.err (!%p410_p2)
}
   0x9   :  { %s414_s27 = scalar_lea.vmem %s29_s19, 1024  ;;  %p419_p4 = scmp.lt.s32.totalorder %s29_s19, %s29_s19 }
   0xa   :  { %p415_p3 = scmp.ne.s32.totalorder %s29_s19, %s414_s27  ;;  %p420_p5 = scmp.lt.s32.totalorder %s414_s27, %s414_s27 }
   0xc   :  { %p421_p6 = por %p420_p5, %p419_p4 }
   0xe   :  { %p422_p7 = pnand %p421_p6, %p415_p3 }
  0x10   :  { %425 = shalt.err (!%p422_p7)
}
  0x11   :  { %s499_s28 = smov 64   ;;  %s500_s29 = smov 4  }
  0x12   :  { %34 = dma.hbm_to_vmem [thread:$0]  %s597_s1, 1024, %s29_s19, [#allocation6], %s499_s28, %s499_s28, %s500_s29  }
  0x13   :  { %s501_s7 = smov [#allocation2]   ;;  %s502_s9 = smov [#allocation7]  }
  0x14   :  { %s19_s8 = sshll.u32 %s501_s7, 4  ;;  %s42_s10 = sshll.u32 %s502_s9, 4  ;;  %s20_s8 = int_to_ptr.vmem [resolvable:$true] %s19_s8  ;;  %s43_s10 = int_to_ptr.vmem [resolvable:$true] %s42_s10 }
  0x15   :  { %s426_s13 = scalar_lea.hbm %s596_s0, 128 }
  0x16   :  { %p427_p8 = scmp.ne.s32.totalorder %s596_s0, %s426_s13  ;;  %p430_p9 = scmp.lt.u32.totalorder %s426_s13, %s596_s0 }
  0x18   :  { %p432_p10 = pnand %p430_p9, %p427_p8 }
  0x1a   :  { %435 = shalt.err (!%p432_p10)
}
  0x1b   :  { %s436_s1 = scalar_lea.vmem %s20_s8, 128  ;;  %p441_p12 = scmp.lt.s32.totalorder %s20_s8, %s20_s8 }
  0x1c   :  { %p437_p11 = scmp.ne.s32.totalorder %s20_s8, %s436_s1  ;;  %p442_p13 = scmp.lt.s32.totalorder %s436_s1, %s436_s1 }
  0x1e   :  { %p443_p0 = por %p442_p13, %p441_p12 }
  0x20   :  { %p444_p1 = pnand %p443_p0, %p437_p11 }
  0x22   :  { %447 = shalt.err (!%p444_p1)
}
  0x23   :  { %22 = dma.hbm_to_vmem [thread:$0]  %s596_s0, 128, %s20_s8, [#allocation3]  }
  0x24   :  { %s448_s22 = scalar_lea.hbm %s599_s3, 1024 }
  0x25   :  { %p449_p2 = scmp.ne.s32.totalorder %s599_s3, %s448_s22  ;;  %p452_p3 = scmp.lt.u32.totalorder %s448_s22, %s599_s3 }
  0x27   :  { %p454_p4 = pnand %p452_p3, %p449_p2 }
  0x29   :  { %457 = shalt.err (!%p454_p4)
}
  0x2a   :  { %s458_s27 = scalar_lea.vmem %s43_s10, 1024  ;;  %p463_p6 = scmp.lt.s32.totalorder %s43_s10, %s43_s10 }
  0x2b   :  { %p459_p5 = scmp.ne.s32.totalorder %s43_s10, %s458_s27  ;;  %p464_p7 = scmp.lt.s32.totalorder %s458_s27, %s458_s27 }
  0x2d   :  { %p465_p8 = por %p464_p7, %p463_p6 }
  0x2f   :  { %p466_p9 = pnand %p465_p8, %p459_p5 }
  0x31   :  { %469 = shalt.err (!%p466_p9)
}
  0x32   :  { %48 = dma.hbm_to_vmem [thread:$0]  %s599_s3, 1024, %s43_s10, [#allocation6], %s499_s28, %s499_s28, %s500_s29  }
  0x33   :  { %492 = dma.done.wait [#allocation3], 128  }
  0x34   :  { %493 = vsyncadd [#allocation3], 4294967168 }
  0x35   :  { %494 = dma.done.wait [#allocation6], 2048  }
  0x36   :  { %495 = vsyncadd [#allocation6], 4294965248  ;;  %v503_v0 = vmov 0.0   ;;  %vm504_vm0 = vmmov 0   ;;  %v388_v1 = vld [vmem:[#allocation5] sm:$0xff]   ;;  %v389_v2 = vld [vmem:[#allocation5 + $0x8] sm:$0xff]  }
  0x37   :  { %340 = vmatprep.subr.bf16.mxu0 %v503_v0  ;;  %356 = vmatprep.mubr.msk.bf16.mxu0 %vm504_vm0, %v503_v0  ;;  %v390_v3 = vld [vmem:[#allocation5 + $0x10] sm:$0xff]   ;;  %v396_v4 = vld [vmem:[#allocation7] sm:$0xff]   ;;  %v391_v5 = vld [vmem:[#allocation5 + $0x18] sm:$0xff]   ;;  %s505_s7 = smov [#allocation8]  }
  0x38   :  { %360 = vmatprep.subr.bf16.mxu1 %v503_v0  ;;  %376 = vmatprep.mubr.msk.bf16.mxu1 %vm504_vm0, %v503_v0  ;;  %v397_v6 = vld [vmem:[#allocation7 + $0x8] sm:$0xff]   ;;  %v392_v7 = vld [vmem:[#allocation5 + $0x20] sm:$0xff]   ;;  %v398_v8 = vld [vmem:[#allocation7 + $0x10] sm:$0xff]   ;;  %s294_s8 = sshll.u32 %s505_s7, 4  ;;  %s295_s8 = int_to_ptr.vmem [resolvable:$true] %s294_s8 }
  0x39   :  { %341 = vmatpush3.bf16.msra.mxu0 %v388_v1  ;;  %361 = vmatpush3.bf16.msra.mxu1 %v396_v4  ;;  %v393_v9 = vld [vmem:[#allocation5 + $0x28] sm:$0xff]   ;;  %v399_v10 = vld [vmem:[#allocation7 + $0x18] sm:$0xff]   ;;  %v394_v11 = vld [vmem:[#allocation5 + $0x30] sm:$0xff]   ;;  %p475_p11 = scmp.lt.s32.totalorder %s295_s8, %s295_s8 }
  0x3a   :  { %342 = vmatprep.subr.bf16.mxu0 %v503_v0  ;;  %362 = vmatprep.subr.bf16.mxu1 %v503_v0  ;;  %v400_v12 = vld [vmem:[#allocation7 + $0x20] sm:$0xff]   ;;  %v395_v13 = vld [vmem:[#allocation5 + $0x38] sm:$0xff]   ;;  %v401_v15 = vld [vmem:[#allocation7 + $0x28] sm:$0xff]  }
  0x3b   :  { %v61_v14 = vld [vmem:[#allocation2] sm:$0xff]  ;;  %v402_v17 = vld [vmem:[#allocation7 + $0x30] sm:$0xff]  }
  0x3c   :  { %v62_v16 = vpack.c.bf16 %v61_v14, %v61_v14  ;;  %v403_v18 = vld [vmem:[#allocation7 + $0x38] sm:$0xff]  }
  0x3d   :  { %343 = vmatpush3.bf16.msra.mxu0 %v389_v2  ;;  %363 = vmatpush3.bf16.msra.mxu1 %v397_v6  ;;  %v304_v19 = vld [vmem:[%s598_s2] ss:$0 sm:$0xff]  ;;  %s470_s2 = scalar_lea.vmem %s295_s8, 128 }
  0x3e   :  { %344 = vmatprep.subr.bf16.mxu0 %v503_v0  ;;  %364 = vmatprep.subr.bf16.mxu1 %v503_v0  ;;  %v313_v27 = vld [vmem:[%s600_s4] ss:$0 sm:$0xff]  ;;  %p471_p10 = scmp.ne.s32.totalorder %s295_s8, %s470_s2  ;;  %p476_p12 = scmp.lt.s32.totalorder %s470_s2, %s470_s2 }
  0x40   :  { %p477_p13 = por %p476_p12, %p475_p11 }
  0x41   :  { %345 = vmatpush3.bf16.msra.mxu0 %v390_v3  ;;  %365 = vmatpush3.bf16.msra.mxu1 %v398_v8 }
  0x42   :  { %346 = vmatprep.subr.bf16.mxu0 %v503_v0  ;;  %366 = vmatprep.subr.bf16.mxu1 %v503_v0  ;;  %p478_p0 = pnand %p477_p13, %p471_p10 }
  0x45   :  { %347 = vmatpush3.bf16.msra.mxu0 %v391_v5  ;;  %367 = vmatpush3.bf16.msra.mxu1 %v399_v10 }
  0x46   :  { %348 = vmatprep.subr.bf16.mxu0 %v503_v0  ;;  %368 = vmatprep.subr.bf16.mxu1 %v503_v0 }
  0x49   :  { %349 = vmatpush3.bf16.msra.mxu0 %v392_v7  ;;  %369 = vmatpush3.bf16.msra.mxu1 %v400_v12 }
  0x4a   :  { %350 = vmatprep.subr.bf16.mxu0 %v503_v0  ;;  %370 = vmatprep.subr.bf16.mxu1 %v503_v0 }
  0x4d   :  { %351 = vmatpush3.bf16.msra.mxu0 %v393_v9  ;;  %371 = vmatpush3.bf16.msra.mxu1 %v401_v15 }
  0x4e   :  { %352 = vmatprep.subr.bf16.mxu0 %v503_v0  ;;  %372 = vmatprep.subr.bf16.mxu1 %v503_v0 }
  0x51   :  { %353 = vmatpush3.bf16.msra.mxu0 %v394_v11  ;;  %373 = vmatpush3.bf16.msra.mxu1 %v402_v17 }
  0x52   :  { %354 = vmatprep.subr.bf16.mxu0 %v503_v0  ;;  %374 = vmatprep.subr.bf16.mxu1 %v503_v0 }
  0x55   :  { %355 = vmatpush3.bf16.msra.mxu0 %v395_v13  ;;  %375 = vmatpush3.bf16.msra.mxu1 %v403_v18 }
  0x58   :  { %357 = vmatmul.mubr.bf16.vlgmr.msra.gmra.mrb[0].mxu0 %v62_v16 }
 0x12b   :  { %v168_v20 = vpop.f32.mrb[0].mxu0 }
 0x12c   :  { %v169_v21 = vadd.f32 %v304_v19, %v168_v20  ;;  %v358_v22 = vpop.f32.mrb[1].mxu0 }
 0x12d   :  { %v171_v23 = vpop.f32.mrb[2].mxu0 }
 0x12e   :  { %v174_v24 = vmax.f32 %v169_v21, 0.0  ;;  %v359_v25 = vpop.f32.mrb[3].mxu0 }
 0x130   :  { %v175_v26 = vpack.c.bf16 %v174_v24, %v174_v24 }
 0x132   :  { %377 = vmatmul.mubr.bf16.vlgmr.msra.gmra.mrb[0].mxu1 %v175_v26 }
 0x205   :  { %v281_v28 = vpop.f32.mrb[0].mxu1 }
 0x206   :  { %v282_v29 = vadd.f32 %v313_v27, %v281_v28  ;;  %v378_v30 = vpop.f32.mrb[1].mxu1 }
 0x207   :  { %v284_v31 = vpop.f32.mrb[2].mxu1 }
 0x208   :  { %287 = vst [vmem:[#allocation8] sm:$0xff] %v282_v29  ;;  %v379_v32 = vpop.f32.mrb[3].mxu1 }
 0x209   :  { %481 = shalt.err (!%p478_p0)
}
 0x20a   :  { %s482_s4 = scalar_lea.hbm %s601_s5, 128 }
 0x20b   :  { %p483_p1 = scmp.ne.s32.totalorder %s601_s5, %s482_s4  ;;  %p486_p2 = scmp.lt.u32.totalorder %s482_s4, %s601_s5 }
 0x20d   :  { %p488_p3 = pnand %p486_p2, %p483_p1 }
 0x20f   :  { %491 = shalt.err (!%p488_p3)
}
 0x210   :  { %297 = dma.vmem_to_hbm [thread:$0]  %s295_s8, 128, %s601_s5, [#allocation4]  }
 0x211   :  { %496 = dma.done.wait [#allocation4], 128  }
 0x212   :  { %497 = vsyncadd [#allocation4], 4294967168 }
 0x213   :  { %301 = vsyncpa [#allocation3], 1 }
 0x214   :  { %302 = vsyncpa [#allocation6], 1 }
 0x215   :  { %303 = vsyncpa [#allocation4], 1 }

</bundles_post_ra>
